<compile_context>
chip_gen: v7x
topology: tpu7x:2x2x1
jax: 0.10.0
libtpu: 0.0.40
codegen_flags: <defaults>
</compile_context>

<pallas_src>
import functools

import jax
import jax.numpy as jnp
from jax.experimental import pallas as pl
from jax.experimental.pallas import tpu as pltpu

N_HIDDEN = [32, 16, 8]
DEFAULT_TILE_B = 8192          # rows per grid step (multiple of 8)
VMEM_LIMIT_BYTES = 48 << 20    # enough for 8192-row double-buffered tiles on
                               # v5e/v6e/v7x, with headroom under v7x's 64 MiB


def _round_up(x, m):
    return (x + m - 1) // m * m


def nqs_kernel(x_ref,
               w0_ref, b0_ref,
               w1_ref, b1_ref,
               w2_ref, b2_ref,
               w3_ref,
               o_ref):
    """One batch tile: 3x (f32 matmul -> bias + sigmoid) + final f32 matmul."""
    # x travels over HBM as bf16 (halves input read traffic); all compute f32.
    h = x_ref[...].astype(jnp.float32)                                # (tile_b, n_in)

    # hidden layer 0
    z = jnp.dot(h, w0_ref[...], preferred_element_type=jnp.float32) + b0_ref[...]
    h = jax.nn.sigmoid(z)

    # hidden layer 1
    z = jnp.dot(h, w1_ref[...], preferred_element_type=jnp.float32) + b1_ref[...]
    h = jax.nn.sigmoid(z)

    # hidden layer 2
    z = jnp.dot(h, w2_ref[...], preferred_element_type=jnp.float32) + b2_ref[...]
    h = jax.nn.sigmoid(z)

    # output layer (no bias, no activation); stored at its true width n_out.
    o_ref[...] = jnp.dot(h, w3_ref[...], preferred_element_type=jnp.float32)


def prepare_params(weights, biases):
    """One-time parameter prep (hoisted out of the forward path).

    weights[i]: (out_i, in_i) torch-style; biases[i]: (out_i,).
    Returns f32 (in, out) weights (VMEM-resident, so dtype costs nothing) and
    f32 (1, out) biases, plus the true n_out.
    """
    n_out = weights[-1].shape[0]
    wts = tuple(jnp.transpose(w).astype(jnp.float32) for w in weights)        # (in, out)
    bs = tuple(b.reshape(1, -1).astype(jnp.float32) for b in biases)          # (1, out)
    return wts, bs, n_out


def nqs_forward(x, prepared_w, prepared_b, n_out, tile_b=DEFAULT_TILE_B):
    """x: (B, n_in) f32/bf16. Returns (B, n_out) f32."""
    B, n_in = x.shape
    w0, w1, w2, w3 = prepared_w
    b0, b1, b2 = prepared_b

    # Batch tile: multiple of 8, no larger than needed for small batches.
    tile_b = min(tile_b, _round_up(max(B, 1), 8))
    B_pad = _round_up(B, tile_b)

    x_bf = x.astype(jnp.bfloat16)
    if B_pad != B:
        x_bf = jnp.pad(x_bf, ((0, B_pad - B), (0, 0)))

    # Weights/biases: full-array blocks, constant index_map -> loaded once,
    # VMEM-resident across the batch grid.
    resident = lambda arr: pl.BlockSpec(arr.shape, lambda i: (0, 0))

    out_padded = pl.pallas_call(
        nqs_kernel,
        out_shape=jax.ShapeDtypeStruct((B_pad, n_out), jnp.float32),
        grid=(pl.cdiv(B_pad, tile_b),),
        in_specs=[
            pl.BlockSpec((tile_b, n_in), lambda i: (i, 0)),   # x: batch tiled
            resident(w0), resident(b0),
            resident(w1), resident(b1),
            resident(w2), resident(b2),
            resident(w3),
        ],
        # n_out equals the full output array's last dim, so a narrow block is
        # legal; this keeps HBM writeback at exactly n_out f32 per row.
        out_specs=pl.BlockSpec((tile_b, n_out), lambda i: (i, 0)),
        compiler_params=pltpu.CompilerParams(
            dimension_semantics=("parallel",),
            vmem_limit_bytes=VMEM_LIMIT_BYTES),
    )(x_bf, w0, b0, w1, b1, w2, b2, w3)

    if B_pad != B:
        return out_padded[:B]
    return out_padded


def reference_forward(x, weights, biases):
    """Plain-JAX f32 reference mirroring the PyTorch module."""
    h = x
    for i in range(3):
        h = jax.nn.sigmoid(h @ weights[i].T + biases[i])
    return h @ weights[3].T


if __name__ == "__main__":
    n_in, n_out = 16, 4
    batch = 8

    key = jax.random.PRNGKey(0)
    keys = jax.random.split(key, 9)

    # Deterministic "torch.rand"-like init: uniform [0, 1).
    layer_dims = list(zip(N_HIDDEN + [n_out], [n_in] + N_HIDDEN))  # (out, in)
    weights = [jax.random.uniform(keys[i], (o, i_), dtype=jnp.float32)
               for i, (o, i_) in enumerate(layer_dims)]
    biases = [jax.random.uniform(keys[4 + i], (N_HIDDEN[i],), dtype=jnp.float32)
              for i in range(3)]
    x = jax.random.uniform(keys[8], (batch, n_in), dtype=jnp.float32)

    # One-time parameter prep, then a jitted forward.
    pw, pb, n_out_real = prepare_params(weights, biases)
    fwd = jax.jit(functools.partial(nqs_forward, prepared_w=pw, prepared_b=pb,
                                    n_out=n_out_real))

    out = jax.block_until_ready(fwd(x))

    ref = reference_forward(x, weights, biases)
    assert out.shape == (batch, n_out), out.shape
    max_err = jnp.max(jnp.abs(out - ref))
    # Only x is bf16-quantized; everything else is f32 -> tight error.
    assert jnp.allclose(out, ref, rtol=2e-2, atol=2e-2), f"max abs err {max_err}"

    print("KERNEL_OK")
</pallas_src>

<mosaic_0001>
module attributes {stable_mosaic.version = 11 : i64} {
  func.func @nqs_kernel(%arg0: i32, %arg1: memref<8x16xbf16, #tpu.memory_space<vmem>>, %arg2: memref<16x32xf32, #tpu.memory_space<vmem>>, %arg3: memref<1x32xf32, #tpu.memory_space<vmem>>, %arg4: memref<32x16xf32, #tpu.memory_space<vmem>>, %arg5: memref<1x16xf32, #tpu.memory_space<vmem>>, %arg6: memref<16x8xf32, #tpu.memory_space<vmem>>, %arg7: memref<1x8xf32, #tpu.memory_space<vmem>>, %arg8: memref<8x4xf32, #tpu.memory_space<vmem>>, %arg9: memref<8x4xf32, #tpu.memory_space<vmem>>) attributes {dimension_semantics = [#tpu.dimension_semantics<parallel>], iteration_bounds = array<i64: 1>, scalar_prefetch = 0 : i64, scratch_operands = 0 : i64, tpu.core_type = #tpu.core_type<tc>, window_params = [{transform_indices = @transform_0, window_bounds = array<i64: 8, 16>}, {pipeline_mode = #tpu.pipeline_mode<synchronous>, transform_indices = @transform_1, window_bounds = array<i64: 16, 32>}, {pipeline_mode = #tpu.pipeline_mode<synchronous>, transform_indices = @transform_2, window_bounds = array<i64: 1, 32>}, {pipeline_mode = #tpu.pipeline_mode<synchronous>, transform_indices = @transform_3, window_bounds = array<i64: 32, 16>}, {pipeline_mode = #tpu.pipeline_mode<synchronous>, transform_indices = @transform_4, window_bounds = array<i64: 1, 16>}, {pipeline_mode = #tpu.pipeline_mode<synchronous>, transform_indices = @transform_5, window_bounds = array<i64: 16, 8>}, {pipeline_mode = #tpu.pipeline_mode<synchronous>, transform_indices = @transform_6, window_bounds = array<i64: 1, 8>}, {pipeline_mode = #tpu.pipeline_mode<synchronous>, transform_indices = @transform_7, window_bounds = array<i64: 8, 4>}, {transform_indices = @transform_8, window_bounds = array<i64: 8, 4>}]} {
    %c0 = arith.constant 0 : index
    %c0_0 = arith.constant 0 : index
    %0 = vector.load %arg1[%c0, %c0_0] : memref<8x16xbf16, #tpu.memory_space<vmem>>, vector<8x16xbf16>
    %1 = arith.extf %0 : vector<8x16xbf16> to vector<8x16xf32>
    %c0_1 = arith.constant 0 : index
    %c0_2 = arith.constant 0 : index
    %2 = vector.load %arg2[%c0_1, %c0_2] : memref<16x32xf32, #tpu.memory_space<vmem>>, vector<16x32xf32>
    %cst = arith.constant dense<0.000000e+00> : vector<8x32xf32>
    %3 = tpu.matmul %1, %2, %cst {dimension_numbers = #tpu.dot_dimension_numbers<[1], [0], [0], [1], [0, 0, 1, 1], [], []>} : vector<8x16xf32>, vector<16x32xf32>, vector<8x32xf32> -> vector<8x32xf32>
    %c0_3 = arith.constant 0 : index
    %c0_4 = arith.constant 0 : index
    %4 = vector.load %arg3[%c0_3, %c0_4] : memref<1x32xf32, #tpu.memory_space<vmem>>, vector<1x32xf32>
    %5 = vector.broadcast %4 : vector<1x32xf32> to vector<8x32xf32>
    %6 = arith.addf %3, %5 : vector<8x32xf32>
    %7 = arith.negf %6 : vector<8x32xf32>
    %8 = math.exp %7 : vector<8x32xf32>
    %cst_5 = arith.constant 1.000000e+00 : f32
    %9 = vector.broadcast %cst_5 : f32 to vector<8x32xf32>
    %10 = arith.addf %9, %8 : vector<8x32xf32>
    %11 = arith.divf %9, %10 : vector<8x32xf32>
    %c0_6 = arith.constant 0 : index
    %c0_7 = arith.constant 0 : index
    %12 = vector.load %arg4[%c0_6, %c0_7] : memref<32x16xf32, #tpu.memory_space<vmem>>, vector<32x16xf32>
    %cst_8 = arith.constant dense<0.000000e+00> : vector<8x16xf32>
    %13 = tpu.matmul %11, %12, %cst_8 {dimension_numbers = #tpu.dot_dimension_numbers<[1], [0], [0], [1], [0, 0, 1, 1], [], []>} : vector<8x32xf32>, vector<32x16xf32>, vector<8x16xf32> -> vector<8x16xf32>
    %c0_9 = arith.constant 0 : index
    %c0_10 = arith.constant 0 : index
    %14 = vector.load %arg5[%c0_9, %c0_10] : memref<1x16xf32, #tpu.memory_space<vmem>>, vector<1x16xf32>
    %15 = vector.broadcast %14 : vector<1x16xf32> to vector<8x16xf32>
    %16 = arith.addf %13, %15 : vector<8x16xf32>
    %17 = arith.negf %16 : vector<8x16xf32>
    %18 = math.exp %17 : vector<8x16xf32>
    %cst_11 = arith.constant 1.000000e+00 : f32
    %19 = vector.broadcast %cst_11 : f32 to vector<8x16xf32>
    %20 = arith.addf %19, %18 : vector<8x16xf32>
    %21 = arith.divf %19, %20 : vector<8x16xf32>
    %c0_12 = arith.constant 0 : index
    %c0_13 = arith.constant 0 : index
    %22 = vector.load %arg6[%c0_12, %c0_13] : memref<16x8xf32, #tpu.memory_space<vmem>>, vector<16x8xf32>
    %cst_14 = arith.constant dense<0.000000e+00> : vector<8x8xf32>
    %23 = tpu.matmul %21, %22, %cst_14 {dimension_numbers = #tpu.dot_dimension_numbers<[1], [0], [0], [1], [0, 0, 1, 1], [], []>} : vector<8x16xf32>, vector<16x8xf32>, vector<8x8xf32> -> vector<8x8xf32>
    %c0_15 = arith.constant 0 : index
    %c0_16 = arith.constant 0 : index
    %24 = vector.load %arg7[%c0_15, %c0_16] : memref<1x8xf32, #tpu.memory_space<vmem>>, vector<1x8xf32>
    %25 = vector.broadcast %24 : vector<1x8xf32> to vector<8x8xf32>
    %26 = arith.addf %23, %25 : vector<8x8xf32>
    %27 = arith.negf %26 : vector<8x8xf32>
    %28 = math.exp %27 : vector<8x8xf32>
    %cst_17 = arith.constant 1.000000e+00 : f32
    %29 = vector.broadcast %cst_17 : f32 to vector<8x8xf32>
    %30 = arith.addf %29, %28 : vector<8x8xf32>
    %31 = arith.divf %29, %30 : vector<8x8xf32>
    %c0_18 = arith.constant 0 : index
    %c0_19 = arith.constant 0 : index
    %32 = vector.load %arg8[%c0_18, %c0_19] : memref<8x4xf32, #tpu.memory_space<vmem>>, vector<8x4xf32>
    %cst_20 = arith.constant dense<0.000000e+00> : vector<8x4xf32>
    %33 = tpu.matmul %31, %32, %cst_20 {dimension_numbers = #tpu.dot_dimension_numbers<[1], [0], [0], [1], [0, 0, 1, 1], [], []>} : vector<8x8xf32>, vector<8x4xf32>, vector<8x4xf32> -> vector<8x4xf32>
    %c0_21 = arith.constant 0 : index
    %c0_22 = arith.constant 0 : index
    %34 = vector.load %arg9[%c0_21, %c0_22] : memref<8x4xf32, #tpu.memory_space<vmem>>, vector<8x4xf32>
    tpu.vector_store %arg9[%c0_21, %c0_22], %33 {strides = array<i32>} : memref<8x4xf32, #tpu.memory_space<vmem>>, vector<8x4xf32>,
    return
  }
  func.func @transform_0(%arg0: i32) -> (i32, i32) {
    %c0_i32 = arith.constant 0 : i32
    %c0_i32_0 = arith.constant 0 : i32
    return %arg0, %c0_i32 : i32, i32
  }
  func.func @transform_1(%arg0: i32) -> (i32, i32) {
    %c0_i32 = arith.constant 0 : i32
    %c0_i32_0 = arith.constant 0 : i32
    %c0_i32_1 = arith.constant 0 : i32
    return %c0_i32, %c0_i32_0 : i32, i32
  }
  func.func @transform_2(%arg0: i32) -> (i32, i32) {
    %c0_i32 = arith.constant 0 : i32
    %c0_i32_0 = arith.constant 0 : i32
    %c0_i32_1 = arith.constant 0 : i32
    return %c0_i32, %c0_i32_0 : i32, i32
  }
  func.func @transform_3(%arg0: i32) -> (i32, i32) {
    %c0_i32 = arith.constant 0 : i32
    %c0_i32_0 = arith.constant 0 : i32
    %c0_i32_1 = arith.constant 0 : i32
    return %c0_i32, %c0_i32_0 : i32, i32
  }
  func.func @transform_4(%arg0: i32) -> (i32, i32) {
    %c0_i32 = arith.constant 0 : i32
    %c0_i32_0 = arith.constant 0 : i32
    %c0_i32_1 = arith.constant 0 : i32
    return %c0_i32, %c0_i32_0 : i32, i32
  }
  func.func @transform_5(%arg0: i32) -> (i32, i32) {
    %c0_i32 = arith.constant 0 : i32
    %c0_i32_0 = arith.constant 0 : i32
    %c0_i32_1 = arith.constant 0 : i32
    return %c0_i32, %c0_i32_0 : i32, i32
  }
  func.func @transform_6(%arg0: i32) -> (i32, i32) {
    %c0_i32 = arith.constant 0 : i32
    %c0_i32_0 = arith.constant 0 : i32
    %c0_i32_1 = arith.constant 0 : i32
    return %c0_i32, %c0_i32_0 : i32, i32
  }
  func.func @transform_7(%arg0: i32) -> (i32, i32) {
    %c0_i32 = arith.constant 0 : i32
    %c0_i32_0 = arith.constant 0 : i32
    %c0_i32_1 = arith.constant 0 : i32
    return %c0_i32, %c0_i32_0 : i32, i32
  }
  func.func @transform_8(%arg0: i32) -> (i32, i32) {
    %c0_i32 = arith.constant 0 : i32
    %c0_i32_0 = arith.constant 0 : i32
    return %arg0, %c0_i32 : i32, i32
  }
}

</mosaic_0001>

<bundles_post_ra>
// kernel: nqs_forward.1
= control target key start
LH: loop header
LB: loop body
LE: loop exit
PB: predicated region body
PF: predicated region fallthrough
CT: control target
= control target key end

     0   :  { %13 = vsyncpa [#allocation3], 0  ;;  %s648_s0 = inlined_call_operand.vmem [shape: bf16[8,16], index: 0, kind: input, shape index: {}]   ;;  %s649_s1 = inlined_call_operand.hbm [shape: f32[16,32], index: 1, kind: input, shape index: {}]   ;;  %s650_s2 = inlined_call_operand.vmem [shape: f32[1,32], index: 2, kind: input, shape index: {}]   ;;  %s651_s3 = inlined_call_operand.hbm [shape: f32[32,16], index: 3, kind: input, shape index: {}]   ;;  %s652_s4 = inlined_call_operand.vmem [shape: f32[1,16], index: 4, kind: input, shape index: {}]   ;;  %s653_s5 = inlined_call_operand.vmem [shape: f32[16,8], index: 5, kind: input, shape index: {}]   ;;  %s654_s6 = inlined_call_operand.vmem [shape: f32[1,8], index: 6, kind: input, shape index: {}]   ;;  %s655_s7 = inlined_call_operand.vmem [shape: f32[8,4], index: 7, kind: input, shape index: {}]   ;;  %s656_s8 = inlined_call_operand.vmem [shape: f32[8,4], index: 8, kind: output, shape index: {}]  }
   0x1   :  { %14 = vsyncpa [#allocation5], 0  ;;  %s542_s27 = smov [#allocation2]   ;;  %s494_s9 = scalar_lea.hbm %s649_s1, 256 }
   0x2   :  { %s22_s28 = sshll.u32 %s542_s27, 4  ;;  %p495_p0 = scmp.ne.s32.totalorder %s649_s1, %s494_s9  ;;  %s23_s28 = int_to_ptr.vmem [resolvable:$true] %s22_s28 }
   0x3   :  { %p498_p1 = scmp.lt.u32.totalorder %s494_s9, %s649_s1 }
   0x5   :  { %p500_p2 = pnand %p498_p1, %p495_p0 }
   0x7   :  { %503 = shalt.err (!%p500_p2)
}
   0x8   :  { %s504_s14 = scalar_lea.vmem %s23_s28, 256  ;;  %p509_p4 = scmp.lt.s32.totalorder %s23_s28, %s23_s28 }
   0x9   :  { %p505_p3 = scmp.ne.s32.totalorder %s23_s28, %s504_s14  ;;  %p510_p5 = scmp.lt.s32.totalorder %s504_s14, %s504_s14 }
   0xb   :  { %p511_p6 = por %p510_p5, %p509_p4 }
   0xd   :  { %p512_p7 = pnand %p511_p6, %p505_p3 }
   0xf   :  { %515 = shalt.err (!%p512_p7)
}
  0x10   :  { %s543_s15 = smov 128   ;;  %s544_s16 = smov 8  }
  0x11   :  { %28 = dma.hbm_to_vmem [thread:$0]  %s649_s1, 256, %s23_s28, [#allocation3], %s543_s15, %s543_s15, %s544_s16  }
  0x12   :  { %s545_s19 = smov [#allocation4]   ;;  %s516_s23 = scalar_lea.hbm %s651_s3, 512 }
  0x13   :  { %s36_s20 = sshll.u32 %s545_s19, 4  ;;  %p517_p8 = scmp.ne.s32.totalorder %s651_s3, %s516_s23  ;;  %s37_s20 = int_to_ptr.vmem [resolvable:$true] %s36_s20 }
  0x14   :  { %p520_p9 = scmp.lt.u32.totalorder %s516_s23, %s651_s3 }
  0x16   :  { %p522_p10 = pnand %p520_p9, %p517_p8 }
  0x18   :  { %525 = shalt.err (!%p522_p10)
}
  0x19   :  { %s526_s29 = scalar_lea.vmem %s37_s20, 512  ;;  %p531_p12 = scmp.lt.s32.totalorder %s37_s20, %s37_s20 }
  0x1a   :  { %p527_p11 = scmp.ne.s32.totalorder %s37_s20, %s526_s29  ;;  %p532_p13 = scmp.lt.s32.totalorder %s526_s29, %s526_s29 }
  0x1c   :  { %p533_p0 = por %p532_p13, %p531_p12 }
  0x1e   :  { %p534_p1 = pnand %p533_p0, %p527_p11 }
  0x20   :  { %537 = shalt.err (!%p534_p1)
}
  0x21   :  { %42 = dma.hbm_to_vmem [thread:$0]  %s651_s3, 512, %s37_s20, [#allocation5], %s543_s15, %s543_s15, %s544_s16  }
  0x22   :  { %538 = dma.done.wait [#allocation3], 256  }
  0x23   :  { %539 = vsyncadd [#allocation3], 4294967040 }
  0x24   :  { %540 = dma.done.wait [#allocation5], 512  }
  0x25   :  { %541 = vsyncadd [#allocation5], 4294966784  ;;  %v546_v0 = vmov 0.0|0.0   ;;  %vm547_vm0 = vmmov 0   ;;  %v548_v1 = vmov 0.0   ;;  %v59_v2 = vld [vmem:[#allocation2] sm:$0xff] }
  0x26   :  { %463 = vmatprep.subr.bf16.mxu0 %v546_v0  ;;  %437 = vmatprep.mubr.msk.f32.mxu0 %vm547_vm0, %v548_v1  ;;  %v60_v3 = vld [vmem:[#allocation2 + $0x8] sm:$0xff]  ;;  %v57_v4 = vld [vmem:[%s648_s0] sm:$0xf]  ;;  %vm68_vm1 = vcmask 130048   ;;  %v149_v8 = vld [vmem:[#allocation4 + $0x8] sm:$0xff]  ;;  %vm159_vm2 = vcmask 261120  }
  0x27   :  { %466 = vmatprep.subr.bf16.mxu1 %v546_v0  ;;  %448 = vmatprep.mubr.msk.f32.mxu1 %vm547_vm0, %v548_v1  ;;  %v464_v5 = vpack.c.bf16 %v60_v3, %v59_v2  ;;  %v58_v6 = vunpack.c.l.bf16 %v57_v4  ;;  %v148_v7 = vld [vmem:[#allocation4] sm:$0xff]  ;;  %v150_v9 = vld [vmem:[#allocation4 + $0x10] sm:$0xff]  ;;  %v151_v11 = vld [vmem:[#allocation4 + $0x18] sm:$0xff]  ;;  %vm328_vm3 = vcmask 64512   ;;  %vm402_vm4 = vcmask 31744  }
  0x28   :  { %v467_v10 = vpack.c.bf16 %v149_v8, %v148_v7  ;;  %v470_v12 = vpack.c.bf16 %v151_v11, %v150_v9  ;;  %v410_v13 = vld [vmem:[%s650_s2] ss:$0 sm:$0xff]  ;;  %v240_v22 = vld [vmem:[%s653_s5 + $0x8] sm:$0xff] }
  0x29   :  { %465 = vmatpush3.bf16.msra.mxu0 %v464_v5  ;;  %v239_v21 = vld [vmem:[%s653_s5] sm:$0xff] }
  0x2a   :  { %472 = vmatprep.subr.bf16.mxu0 %v546_v0  ;;  %468 = vmatpush3.bf16.msra.mxu1 %v467_v10  ;;  %v473_v23 = vpack.c.bf16 %v240_v22, %v239_v21  ;;  %v413_v24 = vld [vmem:[%s652_s4] ss:$0 sm:$0xff] }
  0x2b   :  { %469 = vmatprep.subr.bf16.mxu1 %v546_v0  ;;  %v327_v32 = vld [vmem:[%s655_s7] sm:$0xff] }
  0x2c   :  { %438 = vmatmul.mubr.msk.f32.vlgmr.msra.gmra.mrb[0].mxu0 %vm68_vm1, %v58_v6  ;;  %v416_v33 = vld [vmem:[%s654_s6] ss:$0 sm:$0xff] }
  0x2d   :  { %455 = vmatprep.mubr.msk.f32.mxu0 %vm547_vm0, %v548_v1  ;;  %474 = vmatpush3.bf16.msra.mxu0 %v473_v23 }
  0x2e   :  { %471 = vmatpush3.bf16.msra.mxu1 %v470_v12  ;;  %458 = vmatprep.subr.mxu0 %v548_v1 }
  0xff   :  { %v138_v14 = vpop.f32.mrb[0].mxu0 }
 0x100   :  { %v139_v15 = vadd.f32 %v410_v13, %v138_v14  ;;  %v439_v16 = vpop.f32.mrb[1].mxu0 }
 0x102   :  { %v412_v17 = vmul.f32 -1.442695, %v139_v15 }
 0x104   :  { %482 = vpow2.f32 %v412_v17 }
 0x10e   :  { %v483_v18 = vpop.eup %482 }
 0x10f   :  { %v145_v19 = vadd.f32 1.0, %v483_v18 }
 0x111   :  { %484 = vrcp.f32 %v145_v19 }
 0x11b   :  { %v485_v20 = vpop.eup %484 }
 0x11c   :  { %449 = vmatmul.mubr.msk.f32.vlgmr.msra.gmra.mrb[0].mxu1 %vm159_vm2, %v485_v20 }
 0x1ef   :  { %v229_v25 = vpop.f32.mrb[0].mxu1 }
 0x1f0   :  { %v230_v26 = vadd.f32 %v413_v24, %v229_v25  ;;  %v450_v27 = vpop.f32.mrb[1].mxu1 }
 0x1f2   :  { %v415_v28 = vmul.f32 -1.442695, %v230_v26 }
 0x1f4   :  { %486 = vpow2.f32 %v415_v28 }
 0x1fe   :  { %v487_v29 = vpop.eup %486 }
 0x1ff   :  { %v236_v30 = vadd.f32 1.0, %v487_v29 }
 0x201   :  { %488 = vrcp.f32 %v236_v30 }
 0x20b   :  { %v489_v31 = vpop.eup %488 }
 0x20c   :  { %456 = vmatmul.mubr.msk.f32.vlgmr.msra.gmra.mrb[2].mxu0 %vm68_vm1, %v489_v31 }
 0x20d   :  { %460 = vmatprep.mubr.msk.f32.mxu0 %vm547_vm0, %v548_v1  ;;  %459 = vmatpush3.msra.mxu0 %v327_v32 }
 0x2df   :  { %v317_v34 = vpop.f32.mrb[2].mxu0 }
 0x2e0   :  { %v318_v35 = vadd.f32 %v416_v33, %v317_v34  ;;  %v457_v36 = vpop.f32.mrb[3].mxu0 }
 0x2e2   :  { %v418_v37 = vmul.f32 -1.442695, %v318_v35 }
 0x2e4   :  { %490 = vpow2.f32 %v418_v37 }
 0x2ee   :  { %v491_v38 = vpop.eup %490 }
 0x2ef   :  { %v324_v39 = vadd.f32 1.0, %v491_v38 }
 0x2f1   :  { %492 = vrcp.f32 %v324_v39 }
 0x2fb   :  { %v493_v40 = vpop.eup %492 }
 0x2fc   :  { %461 = vmatmul.mubr.msk.f32.vlgmr.msra.gmra.mrb[4].mxu0 %vm328_vm3, %v493_v40 }
 0x3cf   :  { %v398_v41 = vpop.f32.mrb[4].mxu0 }
 0x3d0   :  { %403 = vst.msk [vmem:[%s656_s8] sm:$0xff] %vm402_vm4, %v398_v41  ;;  %v462_v42 = vpop.f32.mrb[5].mxu0 }
 0x3d1   :  { %408 = vsyncpa [#allocation3], 1 }
 0x3d2   :  { %409 = vsyncpa [#allocation5], 1 }

</bundles_post_ra>
